<compile_context>
chip_gen: v7x
topology: tpu7x:2x2x1
jax: 0.10.0
libtpu: 0.0.40
codegen_flags: <defaults>
</compile_context>

<pallas_src>
import functools

import jax
import jax.numpy as jnp
from jax.experimental import pallas as pl
from jax.experimental.pallas import tpu as pltpu


def _round_up(x, m):
    return ((x + m - 1) // m) * m


def _llama_mlp_kernel(x_ref, wgu_ref, wd_ref, o_ref, acc_ref, *, ti):
    # x_ref:   (tm, H)      token tile (resident across the reduction axis)
    # wgu_ref: (H, 2*ti)    fused gate|up weight slab (gate cols [:ti])
    # wd_ref:  (ti, H)      down_proj weight slab (transposed)
    # o_ref:   (tm, H)      output tile (leading split axis squeezed)
    # acc_ref: (tm, H)      f32 accumulator (VMEM scratch)
    k = pl.program_id(2)

    @pl.when(k == 0)
    def _():
        acc_ref[...] = jnp.zeros_like(acc_ref)

    x = x_ref[...]
    # One MXU pass of x against the fused gate|up slab, f32 accumulation.
    gu = jnp.dot(x, wgu_ref[...], preferred_element_type=jnp.float32)
    g = gu[:, :ti]
    u = gu[:, ti:]
    # SiLU (hidden_act="silu"): g * sigmoid(g); VPU/EUP work rides in free
    # slots under the MXU work.
    h = (g * jax.nn.sigmoid(g)) * u
    # Partial down-projection for this slab; cast operand to the weight dtype
    # (bf16 at real sizes) so the MXU runs at full rate, accumulate in f32.
    acc_ref[...] += jnp.dot(h.astype(wd_ref.dtype), wd_ref[...],
                            preferred_element_type=jnp.float32)

    @pl.when(k == pl.num_programs(2) - 1)
    def _():
        o_ref[...] = acc_ref[...].astype(o_ref.dtype)


def _device_profile():
    """Best-effort TPU-generation probe with safe fallbacks."""
    kind = ""
    try:
        kind = jax.devices()[0].device_kind.lower()
    except Exception:
        pass
    vmem_phys = None
    try:
        vmem_phys = int(pltpu.get_tpu_info().vmem_capacity_bytes)
    except Exception:
        pass
    if vmem_phys is None:
        vmem_phys = (64 << 20) if "v7" in kind else (128 << 20)
    return kind, vmem_phys


@functools.partial(
    jax.jit,
    static_argnames=("tm", "ti", "vmem_limit_bytes", "reduction_splits"))
def llama_mlp(x, w_gate, w_up, w_down, *, tm=None, ti=None,
              vmem_limit_bytes=None, reduction_splits=None):
    """x: (B, S, H).  w_gate/w_up: (H, I).  w_down: (I, H)."""
    B, S, H = x.shape
    I = w_gate.shape[1]
    M = B * S

    kind, vmem_phys = _device_profile()
    # Per-generation roofline targets:
    #   v5e  : ~240 FLOP/B knee -> tm=256 is enough; spend VMEM on larger ti.
    #   v6e  : most BW-starved per FLOP -> tm=1024 to approach compute-bound.
    #   v7x  : 64 MiB VMEM per TC -> tm=512 / ti=512, cap the VMEM limit.
    if "v5e" in kind or "v5 lite" in kind or "v5lite" in kind:
        tm_t, ti_t, vl = 256, 1024, 100 << 20
    elif "v6" in kind:
        tm_t, ti_t, vl = 1024, 512, 98 << 20
    elif "v7" in kind or vmem_phys <= (64 << 20):
        tm_t, ti_t, vl = 512, 512, 56 << 20
    else:  # unknown / other (v4, v5p, ...): moderate, VMEM-safe defaults
        tm_t, ti_t, vl = 512, 512, 96 << 20
    vl = min(vl, max(vmem_phys - (8 << 20), 32 << 20))
    if vmem_limit_bytes is None:
        vmem_limit_bytes = vl
    vmem_limit_bytes = int(vmem_limit_bytes)

    x_itemsize = jnp.dtype(x.dtype).itemsize
    w_itemsize = jnp.dtype(w_gate.dtype).itemsize
    # Sublane packing granularity: 8 for 32-bit, 16 for bf16, 32 for 8-bit.
    gran = max(8, 32 // max(x_itemsize, 1))

    if tm is None:
        tm = tm_t
    tm = max(gran, min(_round_up(tm, gran), _round_up(M, gran)))

    if ti is None:
        ti = ti_t
    ti = min(ti, I)

    # Shrink tiles until the (double-buffered) working set fits the budget.
    def _usage(tm_, ti_):
        return (2 * H * 2 * ti_ * w_itemsize     # fused gate|up slab, 2 bufs
                + 2 * ti_ * H * w_itemsize       # down slab, 2 bufs
                + 2 * tm_ * H * x_itemsize       # x tile, 2 bufs
                + 2 * tm_ * H * 4                # out tile, 2 bufs (f32 worst)
                + tm_ * H * 4)                   # f32 accumulator scratch

    budget = int(0.9 * vmem_limit_bytes)
    while _usage(tm, ti) > budget and ti >= 256 and ti % 256 == 0:
        ti //= 2
    while _usage(tm, ti) > budget and tm >= 256 and tm % 256 == 0:
        tm //= 2

    m_pad = _round_up(M, tm)
    i_pad = _round_up(I, ti)
    K = i_pad // ti

    # Decode / single-row-tile shapes: split the reduction over a leading
    # parallel axis so both v7x TensorCores stream half of the weights.
    if reduction_splits is None:
        reduction_splits = 2 if (m_pad == tm and K >= 2 and K % 2 == 0) else 1
    n_splits = reduction_splits if (K % reduction_splits == 0) else 1
    k_per_split = K // n_splits

    x2d = x.reshape(M, H)
    if m_pad != M:
        x2d = jnp.pad(x2d, ((0, m_pad - M), (0, 0)))
    wg, wu, wd = w_gate, w_up, w_down
    if i_pad != I:
        wg = jnp.pad(wg, ((0, 0), (0, i_pad - I)))
        wu = jnp.pad(wu, ((0, 0), (0, i_pad - I)))
        wd = jnp.pad(wd, ((0, i_pad - I), (0, 0)))

    # Fuse gate+up and pre-block as (K, H, 2*ti): each reduction step becomes
    # one contiguous weight DMA (gate cols [:ti], up cols [ti:]).  The down
    # weight's (ti, H) slabs are already contiguous in (I, H).
    # NOTE: at real Llama sizes this repack should be done once at load time.
    wgu = jnp.concatenate(
        [wg.reshape(H, K, ti).transpose(1, 0, 2),
         wu.reshape(H, K, ti).transpose(1, 0, 2)], axis=-1)

    out_dtype = jnp.float32 if n_splits > 1 else x.dtype
    grid = (n_splits, m_pad // tm, k_per_split)

    out3 = pl.pallas_call(
        functools.partial(_llama_mlp_kernel, ti=ti),
        out_shape=jax.ShapeDtypeStruct((n_splits, m_pad, H), out_dtype),
        grid_spec=pltpu.PrefetchScalarGridSpec(
            num_scalar_prefetch=0,
            grid=grid,
            in_specs=[
                # x tile: held resident over the split and reduction axes.
                pl.BlockSpec((tm, H), lambda s, i, k: (i, 0)),
                # fused gate|up slab (leading blocked axis -> contiguous DMA).
                pl.BlockSpec((None, H, 2 * ti),
                             lambda s, i, k: (s * k_per_split + k, 0, 0)),
                # down_proj slab.
                pl.BlockSpec((ti, H),
                             lambda s, i, k: (s * k_per_split + k, 0)),
            ],
            out_specs=pl.BlockSpec((None, tm, H), lambda s, i, k: (s, i, 0)),
            scratch_shapes=[pltpu.VMEM((tm, H), jnp.float32)],
        ),
        compiler_params=pltpu.CompilerParams(
            dimension_semantics=("parallel", "parallel", "arbitrary"),
            vmem_limit_bytes=vmem_limit_bytes,
        ),
    )(x2d, wgu, wd)

    if n_splits > 1:
        out2d = jnp.sum(out3, axis=0).astype(x.dtype)
    else:
        out2d = out3[0]
    if m_pad != M:
        out2d = out2d[:M]
    return out2d.reshape(B, S, H)


def _init_linear_weight(key, in_features, out_features, dtype=jnp.float32):
    # Deterministic init mimicking nn.Linear default: U(-1/sqrt(in), 1/sqrt(in)).
    bound = 1.0 / (in_features ** 0.5)
    w = jax.random.uniform(key, (in_features, out_features),
                           dtype=jnp.float32, minval=-bound, maxval=bound)
    # Stored directly in (in, out) layout for the kernel.
    return w.astype(dtype)


def _reference_mlp(x, w_gate, w_up, w_down):
    g = jnp.einsum("bsh,hi->bsi", x, w_gate)
    u = jnp.einsum("bsh,hi->bsi", x, w_up)
    h = jax.nn.silu(g) * u
    return jnp.einsum("bsi,ih->bsh", h, w_down)


if __name__ == "__main__":
    # --- Small config: hidden_size=32, intermediate_size=64, batch=2, seq=8 ---
    B, S, H, I = 2, 8, 32, 64
    key = jax.random.PRNGKey(0)
    kx, kg, ku, kd = jax.random.split(key, 4)

    x = jax.random.normal(kx, (B, S, H), dtype=jnp.float32)
    w_gate = _init_linear_weight(kg, H, I)   # gate_proj.weight.T
    w_up = _init_linear_weight(ku, H, I)     # up_proj.weight.T
    w_down = _init_linear_weight(kd, I, H)   # down_proj.weight.T

    # f32 path (tight tolerance).
    out = jax.block_until_ready(llama_mlp(x, w_gate, w_up, w_down))
    ref = _reference_mlp(x, w_gate, w_up, w_down)
    assert out.shape == (B, S, H)
    err = float(jnp.max(jnp.abs(out - ref)))
    assert err < 1e-4, f"f32 max abs diff {err}"

    # bf16 path (mixed precision recommended at real Llama sizes).
    xb = x.astype(jnp.bfloat16)
    wgb = w_gate.astype(jnp.bfloat16)
    wub = w_up.astype(jnp.bfloat16)
    wdb = w_down.astype(jnp.bfloat16)
    out_b = jax.block_until_ready(llama_mlp(xb, wgb, wub, wdb))
    ref_b = _reference_mlp(xb.astype(jnp.float32), wgb.astype(jnp.float32),
                           wub.astype(jnp.float32), wdb.astype(jnp.float32))
    assert out_b.dtype == jnp.bfloat16
    err_b = float(jnp.max(jnp.abs(out_b.astype(jnp.float32) - ref_b)))
    assert err_b < 5e-2, f"bf16 max abs diff {err_b}"

    # Decode-shaped bf16 config: exercises M-padding + the split-reduction
    # path (both v7x TensorCores): batch=1, seq=4, hidden=256, inter=2048.
    B2, S2, H2, I2 = 1, 4, 256, 2048
    k2 = jax.random.split(jax.random.PRNGKey(1), 4)
    x2 = jax.random.normal(k2[0], (B2, S2, H2), dtype=jnp.float32).astype(jnp.bfloat16)
    wg2 = _init_linear_weight(k2[1], H2, I2, dtype=jnp.bfloat16)
    wu2 = _init_linear_weight(k2[2], H2, I2, dtype=jnp.bfloat16)
    wd2 = _init_linear_weight(k2[3], I2, H2, dtype=jnp.bfloat16)
    out2 = jax.block_until_ready(llama_mlp(x2, wg2, wu2, wd2))
    ref2 = _reference_mlp(x2.astype(jnp.float32), wg2.astype(jnp.float32),
                          wu2.astype(jnp.float32), wd2.astype(jnp.float32))
    assert out2.shape == (B2, S2, H2)
    rel = float(jnp.max(jnp.abs(out2.astype(jnp.float32) - ref2)) /
                (float(jnp.max(jnp.abs(ref2))) + 1e-6))
    assert rel < 3e-2, f"decode bf16 relative err {rel}"

    print("KERNEL_OK")
</pallas_src>

<mosaic_0001>
module attributes {stable_mosaic.version = 11 : i64} {
  func.func @_llama_mlp_kernel(%arg0: i32, %arg1: i32, %arg2: i32, %arg3: memref<16x32xf32, #tpu.memory_space<vmem>>, %arg4: memref<1x32x128xf32, #tpu.memory_space<vmem>>, %arg5: memref<64x32xf32, #tpu.memory_space<vmem>>, %arg6: memref<1x16x32xf32, #tpu.memory_space<vmem>>, %arg7: memref<16x32xf32, #tpu.memory_space<vmem>>) attributes {dimension_semantics = [#tpu.dimension_semantics<parallel>, #tpu.dimension_semantics<parallel>, #tpu.dimension_semantics<arbitrary>], iteration_bounds = array<i64: 1, 1, 1>, scalar_prefetch = 0 : i64, scratch_operands = 1 : i64, tpu.core_type = #tpu.core_type<tc>, window_params = [{transform_indices = @transform_0, window_bounds = array<i64: 16, 32>}, {transform_indices = @transform_1, window_bounds = array<i64: 1, 32, 128>}, {transform_indices = @transform_2, window_bounds = array<i64: 64, 32>}, {transform_indices = @transform_3, window_bounds = array<i64: 1, 16, 32>}]} {
    %c0_i32 = arith.constant 0 : i32
    %0 = arith.cmpi eq, %arg2, %c0_i32 : i32
    %1 = arith.extui %0 : i1 to i32
    %c0_i32_0 = arith.constant 0 : i32
    %2 = arith.cmpi ne, %1, %c0_i32_0 : i32
    scf.if %2 {
      %cst_15 = arith.constant 0.000000e+00 : f32
      %24 = vector.broadcast %cst_15 : f32 to vector<16x32xf32>
      %c0_16 = arith.constant 0 : index
      %c0_17 = arith.constant 0 : index
      %25 = vector.load %arg7[%c0_16, %c0_17] : memref<16x32xf32, #tpu.memory_space<vmem>>, vector<16x32xf32>
      tpu.vector_store %arg7[%c0_16, %c0_17], %24 {strides = array<i32>} : memref<16x32xf32, #tpu.memory_space<vmem>>, vector<16x32xf32>,
    } else {
    }
    %c0 = arith.constant 0 : index
    %c0_1 = arith.constant 0 : index
    %3 = vector.load %arg3[%c0, %c0_1] : memref<16x32xf32, #tpu.memory_space<vmem>>, vector<16x32xf32>
    %c0_2 = arith.constant 0 : index
    %c0_3 = arith.constant 0 : index
    %c0_4 = arith.constant 0 : index
    %4 = vector.load %arg4[%c0_2, %c0_3, %c0_4] : memref<1x32x128xf32, #tpu.memory_space<vmem>>, vector<1x32x128xf32>
    %5 = vector.shape_cast %4 : vector<1x32x128xf32> to vector<32x128xf32>
    %cst = arith.constant dense<0.000000e+00> : vector<16x128xf32>
    %6 = tpu.matmul %3, %5, %cst {dimension_numbers = #tpu.dot_dimension_numbers<[1], [0], [0], [1], [0, 0, 1, 1], [], []>} : vector<16x32xf32>, vector<32x128xf32>, vector<16x128xf32> -> vector<16x128xf32>
    %7 = vector.extract_strided_slice %6 {offsets = [0, 0], sizes = [16, 64], strides = [1, 1]} : vector<16x128xf32> to vector<16x64xf32>
    %8 = vector.extract_strided_slice %6 {offsets = [0, 64], sizes = [16, 64], strides = [1, 1]} : vector<16x128xf32> to vector<16x64xf32>
    %9 = arith.negf %7 : vector<16x64xf32>
    %10 = math.exp %9 : vector<16x64xf32>
    %cst_5 = arith.constant 1.000000e+00 : f32
    %11 = vector.broadcast %cst_5 : f32 to vector<16x64xf32>
    %12 = arith.addf %11, %10 : vector<16x64xf32>
    %13 = arith.divf %11, %12 : vector<16x64xf32>
    %14 = arith.mulf %7, %13 : vector<16x64xf32>
    %15 = arith.mulf %14, %8 : vector<16x64xf32>
    %c0_6 = arith.constant 0 : index
    %c0_7 = arith.constant 0 : index
    %16 = vector.load %arg7[%c0_6, %c0_7] : memref<16x32xf32, #tpu.memory_space<vmem>>, vector<16x32xf32>
    %c0_8 = arith.constant 0 : index
    %c0_9 = arith.constant 0 : index
    %17 = vector.load %arg5[%c0_8, %c0_9] : memref<64x32xf32, #tpu.memory_space<vmem>>, vector<64x32xf32>
    %cst_10 = arith.constant dense<0.000000e+00> : vector<16x32xf32>
    %18 = tpu.matmul %15, %17, %cst_10 {dimension_numbers = #tpu.dot_dimension_numbers<[1], [0], [0], [1], [0, 0, 1, 1], [], []>} : vector<16x64xf32>, vector<64x32xf32>, vector<16x32xf32> -> vector<16x32xf32>
    %19 = arith.addf %16, %18 : vector<16x32xf32>
    %c0_11 = arith.constant 0 : index
    %c0_12 = arith.constant 0 : index
    %20 = vector.load %arg7[%c0_11, %c0_12] : memref<16x32xf32, #tpu.memory_space<vmem>>, vector<16x32xf32>
    tpu.vector_store %arg7[%c0_11, %c0_12], %19 {strides = array<i32>} : memref<16x32xf32, #tpu.memory_space<vmem>>, vector<16x32xf32>,
    %c0_i32_13 = arith.constant 0 : i32
    %21 = arith.cmpi eq, %arg2, %c0_i32_13 : i32
    %22 = arith.extui %21 : i1 to i32
    %c0_i32_14 = arith.constant 0 : i32
    %23 = arith.cmpi ne, %22, %c0_i32_14 : i32
    scf.if %23 {
      %c0_15 = arith.constant 0 : index
      %c0_16 = arith.constant 0 : index
      %24 = vector.load %arg7[%c0_15, %c0_16] : memref<16x32xf32, #tpu.memory_space<vmem>>, vector<16x32xf32>
      %c0_17 = arith.constant 0 : index
      %c0_18 = arith.constant 0 : index
      %c0_19 = arith.constant 0 : index
      %25 = vector.load %arg6[%c0_17, %c0_18, %c0_19] : memref<1x16x32xf32, #tpu.memory_space<vmem>>, vector<1x16x32xf32>
      %26 = vector.shape_cast %25 : vector<1x16x32xf32> to vector<16x32xf32>
      %27 = vector.shape_cast %24 : vector<16x32xf32> to vector<1x16x32xf32>
      tpu.vector_store %arg6[%c0_17, %c0_18, %c0_19], %27 {strides = array<i32>} : memref<1x16x32xf32, #tpu.memory_space<vmem>>, vector<1x16x32xf32>,
    } else {
    }
    return
  }
  func.func @transform_0(%arg0: i32, %arg1: i32, %arg2: i32) -> (i32, i32) {
    %c0_i32 = arith.constant 0 : i32
    %c0_i32_0 = arith.constant 0 : i32
    return %arg1, %c0_i32 : i32, i32
  }
  func.func @transform_1(%arg0: i32, %arg1: i32, %arg2: i32) -> (i32, i32, i32) {
    %c1_i32 = arith.constant 1 : i32
    %0 = arith.muli %arg0, %c1_i32 : i32
    %1 = arith.addi %0, %arg2 : i32
    %c0_i32 = arith.constant 0 : i32
    %c0_i32_0 = arith.constant 0 : i32
    %c0_i32_1 = arith.constant 0 : i32
    return %1, %c0_i32, %c0_i32_0 : i32, i32, i32
  }
  func.func @transform_2(%arg0: i32, %arg1: i32, %arg2: i32) -> (i32, i32) {
    %c1_i32 = arith.constant 1 : i32
    %0 = arith.muli %arg0, %c1_i32 : i32
    %1 = arith.addi %0, %arg2 : i32
    %c0_i32 = arith.constant 0 : i32
    %c0_i32_0 = arith.constant 0 : i32
    return %1, %c0_i32 : i32, i32
  }
  func.func @transform_3(%arg0: i32, %arg1: i32, %arg2: i32) -> (i32, i32, i32) {
    %c0_i32 = arith.constant 0 : i32
    %c0_i32_0 = arith.constant 0 : i32
    return %arg0, %arg1, %c0_i32 : i32, i32, i32
  }
}

</mosaic_0001>

<bundles_post_ra>
// kernel: llama_mlp.1
= control target key start
LH: loop header
LB: loop body
LE: loop exit
PB: predicated region body
PF: predicated region fallthrough
CT: control target
= control target key end

     0   :  { %8 = vsyncpa [#allocation4], 0  ;;  %s596_s0 = inlined_call_operand.hbm [shape: f32[16,32], index: 0, kind: input, shape index: {}]   ;;  %s597_s1 = inlined_call_operand.hbm [shape: f32[1,32,128], index: 1, kind: input, shape index: {}]   ;;  %s598_s2 = inlined_call_operand.hbm [shape: f32[64,32], index: 2, kind: input, shape index: {}]   ;;  %s599_s3 = inlined_call_operand.hbm [shape: f32[1,16,32], index: 3, kind: output, shape index: {}]  }
   0x1   :  { %9 = vsyncpa [#allocation7], 0 }
   0x2   :  { %10 = vsyncpa [#allocation5], 0  ;;  %s493_s12 = smov [#allocation6]   ;;  %s494_s14 = smov [#allocation3]  }
   0x3   :  { %s32_s13 = sshll.u32 %s493_s12, 4  ;;  %s16_s15 = sshll.u32 %s494_s14, 4  ;;  %s33_s13 = int_to_ptr.vmem [resolvable:$true] %s32_s13  ;;  %s521_s15 = int_to_ptr.vmem [resolvable:$true] %s16_s15 }
   0x4   :  { %s399_s18 = scalar_lea.hbm %s597_s1, 512 }
   0x5   :  { %p400_p0 = scmp.ne.s32.totalorder %s597_s1, %s399_s18  ;;  %p403_p1 = scmp.lt.u32.totalorder %s399_s18, %s597_s1 }
   0x7   :  { %p405_p2 = pnand %p403_p1, %p400_p0 }
   0x9   :  { %408 = shalt.err (!%p405_p2)
}
   0xa   :  { %s409_s23 = scalar_lea.vmem %s33_s13, 512  ;;  %p414_p4 = scmp.lt.s32.totalorder %s33_s13, %s33_s13 }
   0xb   :  { %p410_p3 = scmp.ne.s32.totalorder %s33_s13, %s409_s23  ;;  %p415_p5 = scmp.lt.s32.totalorder %s409_s23, %s409_s23 }
   0xd   :  { %p416_p6 = por %p415_p5, %p414_p4 }
   0xf   :  { %p417_p7 = pnand %p416_p6, %p410_p3 }
  0x11   :  { %420 = shalt.err (!%p417_p7)
}
  0x12   :  { %s495_s24 = smov 128   ;;  %s496_s25 = smov 8  }
  0x13   :  { %38 = dma.hbm_to_vmem [thread:$0]  %s597_s1, 512, %s33_s13, [#allocation7], %s495_s24, %s495_s24, %s496_s25  }
  0x14   :  { %s421_s30 = scalar_lea.hbm %s596_s0, 256 }
  0x15   :  { %p422_p8 = scmp.ne.s32.totalorder %s596_s0, %s421_s30  ;;  %p425_p9 = scmp.lt.u32.totalorder %s421_s30, %s596_s0 }
  0x17   :  { %p427_p10 = pnand %p425_p9, %p422_p8 }
  0x19   :  { %430 = shalt.err (!%p427_p10)
}
  0x1a   :  { %s431_s8 = scalar_lea.vmem %s521_s15, 256  ;;  %p436_p12 = scmp.lt.s32.totalorder %s521_s15, %s521_s15 }
  0x1b   :  { %p432_p11 = scmp.ne.s32.totalorder %s521_s15, %s431_s8  ;;  %p437_p13 = scmp.lt.s32.totalorder %s431_s8, %s431_s8 }
  0x1d   :  { %p438_p0 = por %p437_p13, %p436_p12 }
  0x1f   :  { %p439_p1 = pnand %p438_p0, %p432_p11 }
  0x21   :  { %442 = shalt.err (!%p439_p1)
}
  0x22   :  { %22 = dma.hbm_to_vmem [thread:$0]  %s596_s0, 256, %s521_s15, [#allocation4], %s495_s24, %s495_s24, %s496_s25  }
  0x23   :  { %s497_s10 = smov [#allocation8]   ;;  %s443_s14 = scalar_lea.hbm %s598_s2, 1024 }
  0x24   :  { %s48_s11 = sshll.u32 %s497_s10, 4  ;;  %p444_p2 = scmp.ne.s32.totalorder %s598_s2, %s443_s14  ;;  %s49_s11 = int_to_ptr.vmem [resolvable:$true] %s48_s11 }
  0x25   :  { %p447_p3 = scmp.lt.u32.totalorder %s443_s14, %s598_s2 }
  0x27   :  { %p449_p4 = pnand %p447_p3, %p444_p2 }
  0x29   :  { %452 = shalt.err (!%p449_p4)
}
  0x2a   :  { %s453_s20 = scalar_lea.vmem %s49_s11, 1024  ;;  %p458_p6 = scmp.lt.s32.totalorder %s49_s11, %s49_s11 }
  0x2b   :  { %p454_p5 = scmp.ne.s32.totalorder %s49_s11, %s453_s20  ;;  %p459_p7 = scmp.lt.s32.totalorder %s453_s20, %s453_s20 }
  0x2d   :  { %p460_p8 = por %p459_p7, %p458_p6 }
  0x2f   :  { %p461_p9 = pnand %p460_p8, %p454_p5 }
  0x31   :  { %464 = shalt.err (!%p461_p9)
}
  0x32   :  { %54 = dma.hbm_to_vmem [thread:$0]  %s598_s2, 1024, %s49_s11, [#allocation7], %s495_s24, %s495_s24, %s496_s25  }
  0x33   :  { %487 = dma.done.wait [#allocation4], 256  }
  0x34   :  { %488 = vsyncadd [#allocation4], 4294967040 }
  0x35   :  { %489 = dma.done.wait [#allocation7], 1536  }
  0x36   :  { %490 = vsyncadd [#allocation7], 4294965760  ;;  %vm71_vm0 = vcmask 261120   ;;  %v76_v0 = vld [vmem:[#allocation6] sm:$0xff]  ;;  %v77_v1 = vld [vmem:[#allocation6 + $0x8] sm:$0xff]  ;;  %v498_v20 = vmov 0.0  }
  0x37   :  { %v78_v2 = vld [vmem:[#allocation6 + $0x10] sm:$0xff]  ;;  %v359_v3 = vpack.c.bf16 %v77_v1, %v76_v0  ;;  %v79_v4 = vld [vmem:[#allocation6 + $0x18] sm:$0xff]  ;;  %v188_v8 = vld [vmem:[#allocation8] sm:$0xff]  ;;  %73 = vst.msk [vmem:[#allocation2 + $0x8] sm:$0xff] %vm71_vm0, %v498_v20  ;;  %s499_s2 = smov 64   ;;  %vm196_vm1 = vcmask 523264  }
  0x38   :  { %v74_v5 = vld [vmem:[#allocation3] sm:$0xff]  ;;  %v363_v6 = vpack.c.bf16 %v79_v4, %v78_v2  ;;  %v75_v7 = vld [vmem:[#allocation3 + $0x8] sm:$0xff]  ;;  %v189_v9 = vld [vmem:[#allocation8 + $0x8] sm:$0xff]  ;;  %72 = vst.msk [vmem:[#allocation2] sm:$0xff] %vm71_vm0, %v498_v20  ;;  %s500_s21 = smov [#allocation9]  }
  0x39   :  { %337 = vmatprep.mubr.msk.f32.mxu0 %vm71_vm0, %v74_v5  ;;  %360 = vmatprep.subr.bf16.mxu0 %v359_v3  ;;  %v190_v10 = vld [vmem:[#allocation8 + $0x10] sm:$0xff]  ;;  %v367_v11 = vpack.c.bf16 %v189_v9, %v188_v8  ;;  %v191_v12 = vld [vmem:[#allocation8 + $0x18] sm:$0xff]  ;;  %v192_v14 = vld [vmem:[#allocation8 + $0x20] sm:$0xff]  ;;  %s294_s22 = sshll.u32 %s500_s21, 4  ;;  %s295_s22 = int_to_ptr.vmem [resolvable:$true] %s294_s22 }
  0x3a   :  { %362 = vmatpush3.bf16.msra.mxu0 %v359_v3  ;;  %v371_v13 = vpack.c.bf16 %v191_v12, %v190_v10  ;;  %v193_v15 = vld [vmem:[#allocation8 + $0x28] sm:$0xff]  ;;  %v194_v17 = vld [vmem:[#allocation8 + $0x30] sm:$0xff]  ;;  %v195_v18 = vld [vmem:[#allocation8 + $0x38] sm:$0xff]  ;;  %s465_s23 = scalar_lea.vmem %s295_s22, 256  ;;  %p470_p11 = scmp.lt.s32.totalorder %s295_s22, %s295_s22 }
  0x3b   :  { %364 = vmatprep.subr.bf16.mxu0 %v363_v6  ;;  %368 = vmatprep.subr.bf16.mxu1 %v367_v11  ;;  %v375_v16 = vpack.c.bf16 %v193_v15, %v192_v14  ;;  %v379_v19 = vpack.c.bf16 %v195_v18, %v194_v17  ;;  %p466_p10 = scmp.ne.s32.totalorder %s295_s22, %s465_s23  ;;  %p471_p12 = scmp.lt.s32.totalorder %s465_s23, %s465_s23 }
  0x3c   :  { %370 = vmatpush3.bf16.msra.mxu1 %v367_v11 }
  0x3d   :  { %372 = vmatprep.subr.bf16.mxu1 %v371_v13  ;;  %p472_p13 = por %p471_p12, %p470_p11 }
  0x3e   :  { %366 = vmatpush3.bf16.msra.mxu0 %v363_v6  ;;  %v187_v37 = vld [vmem:[#allocation2 + $0x8] sm:$0xff] }
  0x3f   :  { %v186_v38 = vld [vmem:[#allocation2] sm:$0xff]  ;;  %p473_p0 = pnand %p472_p13, %p466_p10 }
  0x40   :  { %374 = vmatpush3.bf16.msra.mxu1 %v371_v13 }
  0x41   :  { %338 = vmatmul.mubr.msk.f32.vlgmr.msra.gmra.mrb[0].mxu0 %vm71_vm0, %v75_v7  ;;  %376 = vmatprep.subr.bf16.mxu1 %v375_v16 }
  0x44   :  { %378 = vmatpush3.bf16.msra.mxu1 %v375_v16 }
  0x45   :  { %380 = vmatprep.subr.bf16.mxu1 %v379_v19 }
  0x48   :  { %382 = vmatpush3.bf16.msra.mxu1 %v379_v19 }
 0x114   :  { %v339_v21 = vpop.f32.mrb[0].mxu0 }
 0x115   :  { %v153_v22 = vpop.f32.mrb[1].mxu0  ;;  %v310_v24 = vmul.f32 -1.442695, %v339_v21 }
 0x116   :  { %178 = vrot.lane.b32.xlu0 %v153_v22, %s499_s2  ;;  %v309_v23 = vmul.f32 -1.442695, %v153_v22 }
 0x118   :  { %391 = vpow2.f32 %v309_v23 }
 0x119   :  { %393 = vpow2.f32 %v310_v24 }
 0x11a   :  { %180 = vrot.lane.b32.xlu0 %v339_v21, %s499_s2 }
 0x122   :  { %v392_v25 = vpop.eup %391 }
 0x123   :  { %v168_v26 = vadd.f32 1.0, %v392_v25  ;;  %v394_v27 = vpop.eup %393 }
 0x124   :  { %v169_v28 = vadd.f32 1.0, %v394_v27 }
 0x125   :  { %395 = vrcp.f32 %v168_v26 }
 0x126   :  { %397 = vrcp.f32 %v169_v28 }
 0x12f   :  { %v396_v29 = vpop.eup %395 }
 0x130   :  { %v174_v30 = vmul.f32 %v396_v29, %v153_v22  ;;  %v398_v31 = vpop.eup %397 }
 0x131   :  { %v175_v34 = vmul.f32 %v398_v31, %v339_v21 }
 0x188   :  { %v179_v32 = vpop.permute.xlu0 %178 }
 0x189   :  { %v184_v33 = vmul.f32 %v179_v32, %v174_v30 }
 0x18b   :  { %356 = vmatprep.mubr.msk.f32.mxu1 %vm196_vm1, %v184_v33 }
 0x18c   :  { %v181_v35 = vpop.permute.xlu0 %180 }
 0x18d   :  { %v185_v36 = vmul.f32 %v181_v35, %v175_v34 }
 0x18f   :  { %357 = vmatmul.mubr.msk.f32.vlgmr.msra.gmra.mrb[0].mxu1 %vm196_vm1, %v185_v36 }
 0x262   :  { %v358_v39 = vpop.f32.mrb[0].mxu1 }
 0x263   :  { %v279_v40 = vadd.f32 %v358_v39, %v187_v37  ;;  %v269_v41 = vpop.f32.mrb[1].mxu1 }
 0x264   :  { %v278_v42 = vadd.f32 %v269_v41, %v186_v38 }
 0x265   :  { %281 = vst.msk [vmem:[#allocation2 + $0x8] sm:$0xff] %vm71_vm0, %v279_v40 }
 0x266   :  { %280 = vst.msk [vmem:[#allocation2] sm:$0xff] %vm71_vm0, %v278_v42 }
 0x26c   :  { %v286_v43 = vld [vmem:[#allocation2 + $0x8] sm:$0xff] }
 0x26d   :  { %v285_v44 = vld [vmem:[#allocation2] sm:$0xff]  ;;  %288 = vst.msk [vmem:[#allocation9 + $0x8] sm:$0xff] %vm71_vm0, %v286_v43 }
 0x26e   :  { %287 = vst.msk [vmem:[#allocation9] sm:$0xff] %vm71_vm0, %v285_v44 }
 0x26f   :  { %476 = shalt.err (!%p473_p0)
}
 0x270   :  { %s477_s28 = scalar_lea.hbm %s599_s3, 256 }
 0x271   :  { %p478_p1 = scmp.ne.s32.totalorder %s599_s3, %s477_s28  ;;  %p481_p2 = scmp.lt.u32.totalorder %s477_s28, %s599_s3 }
 0x273   :  { %p483_p3 = pnand %p481_p2, %p478_p1 }
 0x275   :  { %486 = shalt.err (!%p483_p3)
}
 0x276   :  { %300 = dma.vmem_to_hbm [thread:$0]  %s295_s22, 256, %s599_s3, [#allocation5], %s495_s24, %s495_s24, %s496_s25  }
 0x277   :  { %491 = dma.done.wait [#allocation5], 256  }
 0x278   :  { %492 = vsyncadd [#allocation5], 4294967040 }
 0x279   :  { %304 = vsyncpa [#allocation4], 1 }
 0x27a   :  { %305 = vsyncpa [#allocation7], 1 }
 0x27b   :  { %306 = vsyncpa [#allocation5], 1 }

</bundles_post_ra>
